<compile_context>
chip_gen: v7x
topology: tpu7x:2x2x1
jax: 0.10.0
libtpu: 0.0.40
codegen_flags: <defaults>
</compile_context>

<pallas_src>
import jax
import jax.numpy as jnp
from jax import lax
from jax.experimental import pallas as pl
from jax.experimental.pallas import tpu as pltpu

# Model hyper-parameters (small, consistent with the module's forward)
N_CLASS = 16   # vocab size == output classes
EMB_SIZE = 8
N_HIDDEN = 32
BATCH = 2
SEQ = 8


def lstm_kernel(zx_ref, h0_ref, c0_ref, wh_ref, hout_ref):
    """Single invocation: unrolled time loop over the whole sequence.

    zx_ref  : (T, B, 4H) f32 -- precomputed x_t @ W_i + (b_i + b_h), time-major
    h0_ref  : (B, H) f32
    c0_ref  : (B, H) f32
    wh_ref  : (H, 4H) f32 stacked recurrent weights [i | f | g | o]
    hout_ref: (B, H) f32 final hidden state
    """
    H = N_HIDDEN
    T = zx_ref.shape[0]
    wh = wh_ref[...]                                   # resident (32, 128)

    def step(t, carry):
        h, c = carry
        # One recurrent matmul per step; input projection already folded into zx.
        z = zx_ref[t] + jnp.dot(h, wh, preferred_element_type=jnp.float32)  # (B, 4H)
        # Full-vreg transcendentals (EUP has slack); pick gates afterwards.
        sig = jax.nn.sigmoid(z)
        tnh = jnp.tanh(z)
        i_t = sig[:, 0 * H:1 * H]
        f_t = sig[:, 1 * H:2 * H]
        g_t = tnh[:, 2 * H:3 * H]
        o_t = sig[:, 3 * H:4 * H]
        c_new = f_t * c + i_t * g_t
        h_new = o_t * jnp.tanh(c_new)
        return h_new, c_new

    h0 = h0_ref[...].astype(jnp.float32)
    c0 = c0_ref[...].astype(jnp.float32)
    h_f, _ = lax.fori_loop(0, T, step, (h0, c0), unroll=True)
    hout_ref[...] = h_f.astype(hout_ref.dtype)


@jax.jit
def text_lstm_forward(tokens, hidden, cell, params):
    """tokens: (B, T) int32; hidden/cell: (B, H) f32. Returns (N_CLASS,) f32."""
    B, T = tokens.shape
    H = N_HIDDEN

    # Stack per-gate weights/biases along the gate axis: [i | f | g | o]
    w_i = jnp.concatenate(
        [params["W_ii"], params["W_if"], params["W_ig"], params["W_io"]], axis=1)  # (E, 4H)
    w_h = jnp.concatenate(
        [params["W_hi"], params["W_hf"], params["W_hg"], params["W_ho"]], axis=1)  # (H, 4H)
    b = (jnp.concatenate([params["b_ii"], params["b_if"], params["b_ig"], params["b_io"]])
         + jnp.concatenate([params["b_hi"], params["b_hf"], params["b_hg"], params["b_ho"]]))

    # Hoisted input projection: (embedding @ W_i)[tokens] == embedding[tokens] @ W_i.
    emb_proj = jnp.dot(params["embedding"], w_i,
                       preferred_element_type=jnp.float32)        # (V, 4H)
    z_x = emb_proj[tokens]                                        # (B, T, 4H)
    z_x = jnp.transpose(z_x, (1, 0, 2)) + b[None, None, :]        # (T, B, 4H) time-major

    h_final = pl.pallas_call(
        lstm_kernel,
        out_shape=jax.ShapeDtypeStruct((B, H), jnp.float32),
        grid=(1,),
        in_specs=[
            pl.BlockSpec((T, B, 4 * H), lambda i: (0, 0, 0)),     # z_x slab (lane-dense)
            pl.BlockSpec((B, H), lambda i: (0, 0)),               # h0
            pl.BlockSpec((B, H), lambda i: (0, 0)),               # c0
            pl.BlockSpec((H, 4 * H), lambda i: (0, 0)),           # W_h (stacked)
        ],
        out_specs=pl.BlockSpec((B, H), lambda i: (0, 0)),
        compiler_params=pltpu.CompilerParams(
            dimension_semantics=("arbitrary",),                   # single sequential step
        ),
    )(z_x, hidden, cell, w_h)

    # torch: outputs = h_t[-1] (last BATCH row), then nn.Linear -- done in plain XLA.
    return jnp.dot(h_final[-1], params["W_out"]) + params["b_out"]


def init_params(key):
    ks = jax.random.split(key, 20)
    p = {}
    p["embedding"] = jax.random.normal(ks[0], (N_CLASS, EMB_SIZE), jnp.float32) * 0.1
    names_ie = ["W_ii", "W_if", "W_ig", "W_io"]
    names_h = ["W_hi", "W_hf", "W_hg", "W_ho"]
    for i, n in enumerate(names_ie):
        p[n] = jax.random.normal(ks[1 + i], (EMB_SIZE, N_HIDDEN), jnp.float32) * 0.1
        p["b" + n[1:]] = jax.random.normal(ks[5 + i], (N_HIDDEN,), jnp.float32) * 0.1
    for i, n in enumerate(names_h):
        p[n] = jax.random.normal(ks[9 + i], (N_HIDDEN, N_HIDDEN), jnp.float32) * 0.1
        p["b" + n[1:]] = jax.random.normal(ks[13 + i], (N_HIDDEN,), jnp.float32) * 0.1
    # nn.Linear(n_hidden, n_class): store as (H, C) == weight.T
    p["W_out"] = jax.random.normal(ks[17], (N_HIDDEN, N_CLASS), jnp.float32) * 0.1
    p["b_out"] = jax.random.normal(ks[18], (N_CLASS,), jnp.float32) * 0.1
    return p


def reference_forward(tokens, hidden, cell, p):
    """Pure-JAX replica of the PyTorch forward, for sanity checking."""
    x = p["embedding"][tokens]            # (B, T, E)
    x = jnp.transpose(x, (1, 0, 2))       # (T, B, E)
    h, c = hidden, cell
    for t in range(x.shape[0]):
        x_t = x[t]
        i_t = jax.nn.sigmoid(x_t @ p["W_ii"] + p["b_ii"] + h @ p["W_hi"] + p["b_hi"])
        f_t = jax.nn.sigmoid(x_t @ p["W_if"] + p["b_if"] + h @ p["W_hf"] + p["b_hf"])
        g_t = jnp.tanh(x_t @ p["W_ig"] + p["b_ig"] + h @ p["W_hg"] + p["b_hg"])
        o_t = jax.nn.sigmoid(x_t @ p["W_io"] + p["b_io"] + h @ p["W_ho"] + p["b_ho"])
        c = f_t * c + i_t * g_t
        h = o_t * jnp.tanh(c)
    outputs = h[-1]                       # (H,) -- last batch row, as in the torch code
    return outputs @ p["W_out"] + p["b_out"]


if __name__ == "__main__":
    key = jax.random.PRNGKey(0)
    kp, kx, kh, kc = jax.random.split(key, 4)

    params = init_params(kp)
    tokens = jax.random.randint(kx, (BATCH, SEQ), 0, N_CLASS, dtype=jnp.int32)
    hidden = jax.random.normal(kh, (BATCH, N_HIDDEN), jnp.float32) * 0.1
    cell = jax.random.normal(kc, (BATCH, N_HIDDEN), jnp.float32) * 0.1

    out = text_lstm_forward(tokens, hidden, cell, params)
    out = jax.block_until_ready(out)

    ref = reference_forward(tokens, hidden, cell, params)
    assert out.shape == (N_CLASS,)
    assert jnp.allclose(out, ref, atol=1e-4, rtol=1e-4), (out, ref)

    print("KERNEL_OK")
</pallas_src>

<mosaic_0001>
module attributes {stable_mosaic.version = 11 : i64} {
  func.func @lstm_kernel(%arg0: i32, %arg1: memref<8x2x128xf32, #tpu.memory_space<vmem>>, %arg2: memref<2x32xf32, #tpu.memory_space<vmem>>, %arg3: memref<2x32xf32, #tpu.memory_space<vmem>>, %arg4: memref<32x128xf32, #tpu.memory_space<vmem>>, %arg5: memref<2x32xf32, #tpu.memory_space<vmem>>) attributes {dimension_semantics = [#tpu.dimension_semantics<arbitrary>], iteration_bounds = array<i64: 1>, scalar_prefetch = 0 : i64, scratch_operands = 0 : i64, tpu.core_type = #tpu.core_type<tc>, window_params = [{pipeline_mode = #tpu.pipeline_mode<synchronous>, transform_indices = @transform_0, window_bounds = array<i64: 8, 2, 128>}, {pipeline_mode = #tpu.pipeline_mode<synchronous>, transform_indices = @transform_1, window_bounds = array<i64: 2, 32>}, {pipeline_mode = #tpu.pipeline_mode<synchronous>, transform_indices = @transform_2, window_bounds = array<i64: 2, 32>}, {pipeline_mode = #tpu.pipeline_mode<synchronous>, transform_indices = @transform_3, window_bounds = array<i64: 32, 128>}, {pipeline_mode = #tpu.pipeline_mode<synchronous>, transform_indices = @transform_4, window_bounds = array<i64: 2, 32>}]} {
    %c0 = arith.constant 0 : index
    %c0_0 = arith.constant 0 : index
    %0 = vector.load %arg4[%c0, %c0_0] : memref<32x128xf32, #tpu.memory_space<vmem>>, vector<32x128xf32>
    %c0_1 = arith.constant 0 : index
    %c0_2 = arith.constant 0 : index
    %1 = vector.load %arg2[%c0_1, %c0_2] : memref<2x32xf32, #tpu.memory_space<vmem>>, vector<2x32xf32>
    %c0_3 = arith.constant 0 : index
    %c0_4 = arith.constant 0 : index
    %2 = vector.load %arg3[%c0_3, %c0_4] : memref<2x32xf32, #tpu.memory_space<vmem>>, vector<2x32xf32>
    %c0_i32 = arith.constant 0 : i32
    %3 = arith.index_cast %c0_i32 : i32 to index
    %c0_5 = arith.constant 0 : index
    %c0_6 = arith.constant 0 : index
    %4 = vector.load %arg1[%3, %c0_5, %c0_6] : memref<8x2x128xf32, #tpu.memory_space<vmem>>, vector<1x2x128xf32>
    %5 = vector.shape_cast %4 : vector<1x2x128xf32> to vector<2x128xf32>
    %cst = arith.constant dense<0.000000e+00> : vector<2x128xf32>
    %6 = tpu.matmul %1, %0, %cst {dimension_numbers = #tpu.dot_dimension_numbers<[1], [0], [0], [1], [0, 0, 1, 1], [], []>} : vector<2x32xf32>, vector<32x128xf32>, vector<2x128xf32> -> vector<2x128xf32>
    %7 = arith.addf %5, %6 : vector<2x128xf32>
    %8 = arith.negf %7 : vector<2x128xf32>
    %9 = math.exp %8 : vector<2x128xf32>
    %cst_7 = arith.constant 1.000000e+00 : f32
    %10 = vector.broadcast %cst_7 : f32 to vector<2x128xf32>
    %11 = arith.addf %10, %9 : vector<2x128xf32>
    %12 = arith.divf %10, %11 : vector<2x128xf32>
    %13 = math.tanh %7 : vector<2x128xf32>
    %14 = vector.extract_strided_slice %12 {offsets = [0, 0], sizes = [2, 32], strides = [1, 1]} : vector<2x128xf32> to vector<2x32xf32>
    %15 = vector.extract_strided_slice %12 {offsets = [0, 32], sizes = [2, 32], strides = [1, 1]} : vector<2x128xf32> to vector<2x32xf32>
    %16 = vector.extract_strided_slice %13 {offsets = [0, 64], sizes = [2, 32], strides = [1, 1]} : vector<2x128xf32> to vector<2x32xf32>
    %17 = vector.extract_strided_slice %12 {offsets = [0, 96], sizes = [2, 32], strides = [1, 1]} : vector<2x128xf32> to vector<2x32xf32>
    %18 = arith.mulf %15, %2 : vector<2x32xf32>
    %19 = arith.mulf %14, %16 : vector<2x32xf32>
    %20 = arith.addf %18, %19 : vector<2x32xf32>
    %21 = math.tanh %20 : vector<2x32xf32>
    %22 = arith.mulf %17, %21 : vector<2x32xf32>
    %c1_i32 = arith.constant 1 : i32
    %23 = arith.index_cast %c1_i32 : i32 to index
    %c0_8 = arith.constant 0 : index
    %c0_9 = arith.constant 0 : index
    %24 = vector.load %arg1[%23, %c0_8, %c0_9] : memref<8x2x128xf32, #tpu.memory_space<vmem>>, vector<1x2x128xf32>
    %25 = vector.shape_cast %24 : vector<1x2x128xf32> to vector<2x128xf32>
    %cst_10 = arith.constant dense<0.000000e+00> : vector<2x128xf32>
    %26 = tpu.matmul %22, %0, %cst_10 {dimension_numbers = #tpu.dot_dimension_numbers<[1], [0], [0], [1], [0, 0, 1, 1], [], []>} : vector<2x32xf32>, vector<32x128xf32>, vector<2x128xf32> -> vector<2x128xf32>
    %27 = arith.addf %25, %26 : vector<2x128xf32>
    %28 = arith.negf %27 : vector<2x128xf32>
    %29 = math.exp %28 : vector<2x128xf32>
    %cst_11 = arith.constant 1.000000e+00 : f32
    %30 = vector.broadcast %cst_11 : f32 to vector<2x128xf32>
    %31 = arith.addf %30, %29 : vector<2x128xf32>
    %32 = arith.divf %30, %31 : vector<2x128xf32>
    %33 = math.tanh %27 : vector<2x128xf32>
    %34 = vector.extract_strided_slice %32 {offsets = [0, 0], sizes = [2, 32], strides = [1, 1]} : vector<2x128xf32> to vector<2x32xf32>
    %35 = vector.extract_strided_slice %32 {offsets = [0, 32], sizes = [2, 32], strides = [1, 1]} : vector<2x128xf32> to vector<2x32xf32>
    %36 = vector.extract_strided_slice %33 {offsets = [0, 64], sizes = [2, 32], strides = [1, 1]} : vector<2x128xf32> to vector<2x32xf32>
    %37 = vector.extract_strided_slice %32 {offsets = [0, 96], sizes = [2, 32], strides = [1, 1]} : vector<2x128xf32> to vector<2x32xf32>
    %38 = arith.mulf %35, %20 : vector<2x32xf32>
    %39 = arith.mulf %34, %36 : vector<2x32xf32>
    %40 = arith.addf %38, %39 : vector<2x32xf32>
    %41 = math.tanh %40 : vector<2x32xf32>
    %42 = arith.mulf %37, %41 : vector<2x32xf32>
    %c2_i32 = arith.constant 2 : i32
    %43 = arith.index_cast %c2_i32 : i32 to index
    %c0_12 = arith.constant 0 : index
    %c0_13 = arith.constant 0 : index
    %44 = vector.load %arg1[%43, %c0_12, %c0_13] : memref<8x2x128xf32, #tpu.memory_space<vmem>>, vector<1x2x128xf32>
    %45 = vector.shape_cast %44 : vector<1x2x128xf32> to vector<2x128xf32>
    %cst_14 = arith.constant dense<0.000000e+00> : vector<2x128xf32>
    %46 = tpu.matmul %42, %0, %cst_14 {dimension_numbers = #tpu.dot_dimension_numbers<[1], [0], [0], [1], [0, 0, 1, 1], [], []>} : vector<2x32xf32>, vector<32x128xf32>, vector<2x128xf32> -> vector<2x128xf32>
    %47 = arith.addf %45, %46 : vector<2x128xf32>
    %48 = arith.negf %47 : vector<2x128xf32>
    %49 = math.exp %48 : vector<2x128xf32>
    %cst_15 = arith.constant 1.000000e+00 : f32
    %50 = vector.broadcast %cst_15 : f32 to vector<2x128xf32>
    %51 = arith.addf %50, %49 : vector<2x128xf32>
    %52 = arith.divf %50, %51 : vector<2x128xf32>
    %53 = math.tanh %47 : vector<2x128xf32>
    %54 = vector.extract_strided_slice %52 {offsets = [0, 0], sizes = [2, 32], strides = [1, 1]} : vector<2x128xf32> to vector<2x32xf32>
    %55 = vector.extract_strided_slice %52 {offsets = [0, 32], sizes = [2, 32], strides = [1, 1]} : vector<2x128xf32> to vector<2x32xf32>
    %56 = vector.extract_strided_slice %53 {offsets = [0, 64], sizes = [2, 32], strides = [1, 1]} : vector<2x128xf32> to vector<2x32xf32>
    %57 = vector.extract_strided_slice %52 {offsets = [0, 96], sizes = [2, 32], strides = [1, 1]} : vector<2x128xf32> to vector<2x32xf32>
    %58 = arith.mulf %55, %40 : vector<2x32xf32>
    %59 = arith.mulf %54, %56 : vector<2x32xf32>
    %60 = arith.addf %58, %59 : vector<2x32xf32>
    %61 = math.tanh %60 : vector<2x32xf32>
    %62 = arith.mulf %57, %61 : vector<2x32xf32>
    %c3_i32 = arith.constant 3 : i32
    %63 = arith.index_cast %c3_i32 : i32 to index
    %c0_16 = arith.constant 0 : index
    %c0_17 = arith.constant 0 : index
    %64 = vector.load %arg1[%63, %c0_16, %c0_17] : memref<8x2x128xf32, #tpu.memory_space<vmem>>, vector<1x2x128xf32>
    %65 = vector.shape_cast %64 : vector<1x2x128xf32> to vector<2x128xf32>
    %cst_18 = arith.constant dense<0.000000e+00> : vector<2x128xf32>
    %66 = tpu.matmul %62, %0, %cst_18 {dimension_numbers = #tpu.dot_dimension_numbers<[1], [0], [0], [1], [0, 0, 1, 1], [], []>} : vector<2x32xf32>, vector<32x128xf32>, vector<2x128xf32> -> vector<2x128xf32>
    %67 = arith.addf %65, %66 : vector<2x128xf32>
    %68 = arith.negf %67 : vector<2x128xf32>
    %69 = math.exp %68 : vector<2x128xf32>
    %cst_19 = arith.constant 1.000000e+00 : f32
    %70 = vector.broadcast %cst_19 : f32 to vector<2x128xf32>
    %71 = arith.addf %70, %69 : vector<2x128xf32>
    %72 = arith.divf %70, %71 : vector<2x128xf32>
    %73 = math.tanh %67 : vector<2x128xf32>
    %74 = vector.extract_strided_slice %72 {offsets = [0, 0], sizes = [2, 32], strides = [1, 1]} : vector<2x128xf32> to vector<2x32xf32>
    %75 = vector.extract_strided_slice %72 {offsets = [0, 32], sizes = [2, 32], strides = [1, 1]} : vector<2x128xf32> to vector<2x32xf32>
    %76 = vector.extract_strided_slice %73 {offsets = [0, 64], sizes = [2, 32], strides = [1, 1]} : vector<2x128xf32> to vector<2x32xf32>
    %77 = vector.extract_strided_slice %72 {offsets = [0, 96], sizes = [2, 32], strides = [1, 1]} : vector<2x128xf32> to vector<2x32xf32>
    %78 = arith.mulf %75, %60 : vector<2x32xf32>
    %79 = arith.mulf %74, %76 : vector<2x32xf32>
    %80 = arith.addf %78, %79 : vector<2x32xf32>
    %81 = math.tanh %80 : vector<2x32xf32>
    %82 = arith.mulf %77, %81 : vector<2x32xf32>
    %c4_i32 = arith.constant 4 : i32
    %83 = arith.index_cast %c4_i32 : i32 to index
    %c0_20 = arith.constant 0 : index
    %c0_21 = arith.constant 0 : index
    %84 = vector.load %arg1[%83, %c0_20, %c0_21] : memref<8x2x128xf32, #tpu.memory_space<vmem>>, vector<1x2x128xf32>
    %85 = vector.shape_cast %84 : vector<1x2x128xf32> to vector<2x128xf32>
    %cst_22 = arith.constant dense<0.000000e+00> : vector<2x128xf32>
    %86 = tpu.matmul %82, %0, %cst_22 {dimension_numbers = #tpu.dot_dimension_numbers<[1], [0], [0], [1], [0, 0, 1, 1], [], []>} : vector<2x32xf32>, vector<32x128xf32>, vector<2x128xf32> -> vector<2x128xf32>
    %87 = arith.addf %85, %86 : vector<2x128xf32>
    %88 = arith.negf %87 : vector<2x128xf32>
    %89 = math.exp %88 : vector<2x128xf32>
    %cst_23 = arith.constant 1.000000e+00 : f32
    %90 = vector.broadcast %cst_23 : f32 to vector<2x128xf32>
    %91 = arith.addf %90, %89 : vector<2x128xf32>
    %92 = arith.divf %90, %91 : vector<2x128xf32>
    %93 = math.tanh %87 : vector<2x128xf32>
    %94 = vector.extract_strided_slice %92 {offsets = [0, 0], sizes = [2, 32], strides = [1, 1]} : vector<2x128xf32> to vector<2x32xf32>
    %95 = vector.extract_strided_slice %92 {offsets = [0, 32], sizes = [2, 32], strides = [1, 1]} : vector<2x128xf32> to vector<2x32xf32>
    %96 = vector.extract_strided_slice %93 {offsets = [0, 64], sizes = [2, 32], strides = [1, 1]} : vector<2x128xf32> to vector<2x32xf32>
    %97 = vector.extract_strided_slice %92 {offsets = [0, 96], sizes = [2, 32], strides = [1, 1]} : vector<2x128xf32> to vector<2x32xf32>
    %98 = arith.mulf %95, %80 : vector<2x32xf32>
    %99 = arith.mulf %94, %96 : vector<2x32xf32>
    %100 = arith.addf %98, %99 : vector<2x32xf32>
    %101 = math.tanh %100 : vector<2x32xf32>
    %102 = arith.mulf %97, %101 : vector<2x32xf32>
    %c5_i32 = arith.constant 5 : i32
    %103 = arith.index_cast %c5_i32 : i32 to index
    %c0_24 = arith.constant 0 : index
    %c0_25 = arith.constant 0 : index
    %104 = vector.load %arg1[%103, %c0_24, %c0_25] : memref<8x2x128xf32, #tpu.memory_space<vmem>>, vector<1x2x128xf32>
    %105 = vector.shape_cast %104 : vector<1x2x128xf32> to vector<2x128xf32>
    %cst_26 = arith.constant dense<0.000000e+00> : vector<2x128xf32>
    %106 = tpu.matmul %102, %0, %cst_26 {dimension_numbers = #tpu.dot_dimension_numbers<[1], [0], [0], [1], [0, 0, 1, 1], [], []>} : vector<2x32xf32>, vector<32x128xf32>, vector<2x128xf32> -> vector<2x128xf32>
    %107 = arith.addf %105, %106 : vector<2x128xf32>
    %108 = arith.negf %107 : vector<2x128xf32>
    %109 = math.exp %108 : vector<2x128xf32>
    %cst_27 = arith.constant 1.000000e+00 : f32
    %110 = vector.broadcast %cst_27 : f32 to vector<2x128xf32>
    %111 = arith.addf %110, %109 : vector<2x128xf32>
    %112 = arith.divf %110, %111 : vector<2x128xf32>
    %113 = math.tanh %107 : vector<2x128xf32>
    %114 = vector.extract_strided_slice %112 {offsets = [0, 0], sizes = [2, 32], strides = [1, 1]} : vector<2x128xf32> to vector<2x32xf32>
    %115 = vector.extract_strided_slice %112 {offsets = [0, 32], sizes = [2, 32], strides = [1, 1]} : vector<2x128xf32> to vector<2x32xf32>
    %116 = vector.extract_strided_slice %113 {offsets = [0, 64], sizes = [2, 32], strides = [1, 1]} : vector<2x128xf32> to vector<2x32xf32>
    %117 = vector.extract_strided_slice %112 {offsets = [0, 96], sizes = [2, 32], strides = [1, 1]} : vector<2x128xf32> to vector<2x32xf32>
    %118 = arith.mulf %115, %100 : vector<2x32xf32>
    %119 = arith.mulf %114, %116 : vector<2x32xf32>
    %120 = arith.addf %118, %119 : vector<2x32xf32>
    %121 = math.tanh %120 : vector<2x32xf32>
    %122 = arith.mulf %117, %121 : vector<2x32xf32>
    %c6_i32 = arith.constant 6 : i32
    %123 = arith.index_cast %c6_i32 : i32 to index
    %c0_28 = arith.constant 0 : index
    %c0_29 = arith.constant 0 : index
    %124 = vector.load %arg1[%123, %c0_28, %c0_29] : memref<8x2x128xf32, #tpu.memory_space<vmem>>, vector<1x2x128xf32>
    %125 = vector.shape_cast %124 : vector<1x2x128xf32> to vector<2x128xf32>
    %cst_30 = arith.constant dense<0.000000e+00> : vector<2x128xf32>
    %126 = tpu.matmul %122, %0, %cst_30 {dimension_numbers = #tpu.dot_dimension_numbers<[1], [0], [0], [1], [0, 0, 1, 1], [], []>} : vector<2x32xf32>, vector<32x128xf32>, vector<2x128xf32> -> vector<2x128xf32>
    %127 = arith.addf %125, %126 : vector<2x128xf32>
    %128 = arith.negf %127 : vector<2x128xf32>
    %129 = math.exp %128 : vector<2x128xf32>
    %cst_31 = arith.constant 1.000000e+00 : f32
    %130 = vector.broadcast %cst_31 : f32 to vector<2x128xf32>
    %131 = arith.addf %130, %129 : vector<2x128xf32>
    %132 = arith.divf %130, %131 : vector<2x128xf32>
    %133 = math.tanh %127 : vector<2x128xf32>
    %134 = vector.extract_strided_slice %132 {offsets = [0, 0], sizes = [2, 32], strides = [1, 1]} : vector<2x128xf32> to vector<2x32xf32>
    %135 = vector.extract_strided_slice %132 {offsets = [0, 32], sizes = [2, 32], strides = [1, 1]} : vector<2x128xf32> to vector<2x32xf32>
    %136 = vector.extract_strided_slice %133 {offsets = [0, 64], sizes = [2, 32], strides = [1, 1]} : vector<2x128xf32> to vector<2x32xf32>
    %137 = vector.extract_strided_slice %132 {offsets = [0, 96], sizes = [2, 32], strides = [1, 1]} : vector<2x128xf32> to vector<2x32xf32>
    %138 = arith.mulf %135, %120 : vector<2x32xf32>
    %139 = arith.mulf %134, %136 : vector<2x32xf32>
    %140 = arith.addf %138, %139 : vector<2x32xf32>
    %141 = math.tanh %140 : vector<2x32xf32>
    %142 = arith.mulf %137, %141 : vector<2x32xf32>
    %c7_i32 = arith.constant 7 : i32
    %143 = arith.index_cast %c7_i32 : i32 to index
    %c0_32 = arith.constant 0 : index
    %c0_33 = arith.constant 0 : index
    %144 = vector.load %arg1[%143, %c0_32, %c0_33] : memref<8x2x128xf32, #tpu.memory_space<vmem>>, vector<1x2x128xf32>
    %145 = vector.shape_cast %144 : vector<1x2x128xf32> to vector<2x128xf32>
    %cst_34 = arith.constant dense<0.000000e+00> : vector<2x128xf32>
    %146 = tpu.matmul %142, %0, %cst_34 {dimension_numbers = #tpu.dot_dimension_numbers<[1], [0], [0], [1], [0, 0, 1, 1], [], []>} : vector<2x32xf32>, vector<32x128xf32>, vector<2x128xf32> -> vector<2x128xf32>
    %147 = arith.addf %145, %146 : vector<2x128xf32>
    %148 = arith.negf %147 : vector<2x128xf32>
    %149 = math.exp %148 : vector<2x128xf32>
    %cst_35 = arith.constant 1.000000e+00 : f32
    %150 = vector.broadcast %cst_35 : f32 to vector<2x128xf32>
    %151 = arith.addf %150, %149 : vector<2x128xf32>
    %152 = arith.divf %150, %151 : vector<2x128xf32>
    %153 = math.tanh %147 : vector<2x128xf32>
    %154 = vector.extract_strided_slice %152 {offsets = [0, 0], sizes = [2, 32], strides = [1, 1]} : vector<2x128xf32> to vector<2x32xf32>
    %155 = vector.extract_strided_slice %152 {offsets = [0, 32], sizes = [2, 32], strides = [1, 1]} : vector<2x128xf32> to vector<2x32xf32>
    %156 = vector.extract_strided_slice %153 {offsets = [0, 64], sizes = [2, 32], strides = [1, 1]} : vector<2x128xf32> to vector<2x32xf32>
    %157 = vector.extract_strided_slice %152 {offsets = [0, 96], sizes = [2, 32], strides = [1, 1]} : vector<2x128xf32> to vector<2x32xf32>
    %158 = arith.mulf %155, %140 : vector<2x32xf32>
    %159 = arith.mulf %154, %156 : vector<2x32xf32>
    %160 = arith.addf %158, %159 : vector<2x32xf32>
    %161 = math.tanh %160 : vector<2x32xf32>
    %162 = arith.mulf %157, %161 : vector<2x32xf32>
    %c8_i32 = arith.constant 8 : i32
    %c0_36 = arith.constant 0 : index
    %c0_37 = arith.constant 0 : index
    %163 = vector.load %arg5[%c0_36, %c0_37] : memref<2x32xf32, #tpu.memory_space<vmem>>, vector<2x32xf32>
    tpu.vector_store %arg5[%c0_36, %c0_37], %162 {strides = array<i32>} : memref<2x32xf32, #tpu.memory_space<vmem>>, vector<2x32xf32>,
    return
  }
  func.func @transform_0(%arg0: i32) -> (i32, i32, i32) {
    %c0_i32 = arith.constant 0 : i32
    %c0_i32_0 = arith.constant 0 : i32
    %c0_i32_1 = arith.constant 0 : i32
    %c0_i32_2 = arith.constant 0 : i32
    return %c0_i32, %c0_i32_0, %c0_i32_1 : i32, i32, i32
  }
  func.func @transform_1(%arg0: i32) -> (i32, i32) {
    %c0_i32 = arith.constant 0 : i32
    %c0_i32_0 = arith.constant 0 : i32
    %c0_i32_1 = arith.constant 0 : i32
    return %c0_i32, %c0_i32_0 : i32, i32
  }
  func.func @transform_2(%arg0: i32) -> (i32, i32) {
    %c0_i32 = arith.constant 0 : i32
    %c0_i32_0 = arith.constant 0 : i32
    %c0_i32_1 = arith.constant 0 : i32
    return %c0_i32, %c0_i32_0 : i32, i32
  }
  func.func @transform_3(%arg0: i32) -> (i32, i32) {
    %c0_i32 = arith.constant 0 : i32
    %c0_i32_0 = arith.constant 0 : i32
    %c0_i32_1 = arith.constant 0 : i32
    return %c0_i32, %c0_i32_0 : i32, i32
  }
  func.func @transform_4(%arg0: i32) -> (i32, i32) {
    %c0_i32 = arith.constant 0 : i32
    %c0_i32_0 = arith.constant 0 : i32
    %c0_i32_1 = arith.constant 0 : i32
    return %c0_i32, %c0_i32_0 : i32, i32
  }
}

</mosaic_0001>

<bundles_post_ra>
// kernel: text_lstm_forward.1
= control target key start
LH: loop header
LB: loop body
LE: loop exit
PB: predicated region body
PF: predicated region fallthrough
CT: control target
= control target key end

     0   :  { %v1119_v0 = vmov 0.0|0.0   ;;  %vm1120_vm0 = vmmov 0   ;;  %v1121_v4 = vmov 0.0   ;;  %vm24_vm1 = vcmask 261120   ;;  %s1122_s25 = smov 64   ;;  %s1123_s28 = smov 32   ;;  %s1287_s3 = inlined_call_operand.vmem [shape: f32[32,128], index: 3, kind: input, shape index: {}]   ;;  %s1288_s1 = inlined_call_operand.vmem [shape: f32[2,32], index: 1, kind: input, shape index: {}]   ;;  %s1289_s0 = inlined_call_operand.vmem [shape: f32[8,2,128], index: 0, kind: input, shape index: {}]   ;;  %s1290_s2 = inlined_call_operand.vmem [shape: f32[2,32], index: 2, kind: input, shape index: {}]   ;;  %s1291_s4 = inlined_call_operand.vmem [shape: f32[2,32], index: 4, kind: output, shape index: {}]  }
   0x1   :  { %1002 = vmatprep.subr.bf16.mxu0 %v1119_v0  ;;  %v17_v1 = vld [vmem:[%s1287_s3] sm:$0xff]  ;;  %v18_v2 = vld [vmem:[%s1287_s3 + $0x8] sm:$0xff]  ;;  %v19_v3 = vld [vmem:[%s1287_s3 + $0x10] sm:$0xff]  ;;  %922 = vmatprep.mubr.msk.f32.mxu0 %vm1120_vm0, %v1121_v4  ;;  %vm845_vm2 = vcmask 254976  }
   0x2   :  { %v1161_v5 = vpack.c.bf16 %v18_v2, %v17_v1  ;;  %v20_v6 = vld [vmem:[%s1287_s3 + $0x18] sm:$0xff]  ;;  %1008 = vmatprep.subr.bf16.mxu1 %v1119_v0  ;;  %933 = vmatprep.mubr.msk.f32.mxu1 %vm1120_vm0, %v1121_v4  ;;  %v21_v8 = vld [vmem:[%s1288_s1] sm:$0x3]  ;;  %v853_v29 = vld [vmem:[%s1289_s0 + $0x2] sm:$0x3] }
   0x3   :  { %v1170_v7 = vpack.c.bf16 %v20_v6, %v19_v3  ;;  %v23_v9 = vld [vmem:[%s1289_s0] sm:$0x3]  ;;  %v856_v47 = vld [vmem:[%s1289_s0 + $0x4] sm:$0x3]  ;;  %v859_v2 = vld [vmem:[%s1289_s0 + $0x6] sm:$0x3] }
   0x4   :  { %1004 = vmatpush3.bf16.msra.mxu0 %v1161_v5  ;;  %1010 = vmatpush3.bf16.msra.mxu1 %v1161_v5  ;;  %v22_v14 = vld [vmem:[%s1290_s2] sm:$0x3] }
   0x5   :  { %1005 = vmatprep.subr.bf16.mxu0 %v1119_v0  ;;  %1011 = vmatprep.subr.bf16.mxu1 %v1119_v0 }
   0x8   :  { %1007 = vmatpush3.bf16.msra.mxu0 %v1170_v7  ;;  %1013 = vmatpush3.bf16.msra.mxu1 %v1170_v7 }
   0x9   :  { %1014 = vmatprep.subr.bf16.mxu0 %v1119_v0  ;;  %1020 = vmatprep.subr.bf16.mxu1 %v1119_v0 }
   0xb   :  { %923 = vmatmul.mubr.msk.f32.vlgmr.msra.gmra.mrb[0].mxu0 %vm24_vm1, %v21_v8 }
   0xc   :  { %1016 = vmatpush3.bf16.msra.mxu0 %v1161_v5  ;;  %944 = vmatprep.mubr.msk.f32.mxu0 %vm1120_vm0, %v1121_v4 }
   0xd   :  { %1017 = vmatprep.subr.bf16.mxu0 %v1119_v0 }
  0x10   :  { %1019 = vmatpush3.bf16.msra.mxu0 %v1170_v7 }
  0x11   :  { %1026 = vmatprep.subr.bf16.mxu0 %v1119_v0 }
  0xde   :  { %v94_v10 = vpop.f32.mrb[0].mxu0 }
  0xdf   :  { %v98_v11 = vadd.f32 %v94_v10, %v23_v9  ;;  %v924_v12 = vpop.f32.mrb[1].mxu0 }
  0xe1   :  { %1055 = vtanh.f32 %v98_v11  ;;  %v852_v15 = vmul.f32 -1.442695, %v98_v11 }
  0xe3   :  { %1057 = vpow2.f32 %v852_v15 }
  0xeb   :  { %v1056_v13 = vpop.eup %1055 }
  0xec   :  { %112 = vrot.lane.b32.xlu0 %v1056_v13, %s1122_s25 }
  0xed   :  { %v1058_v16 = vpop.eup %1057 }
  0xee   :  { %v102_v17 = vadd.f32 1.0, %v1058_v16 }
  0xf0   :  { %107 = vrot.lane.b32.xlu0 %v22_v14, %s1123_s28  ;;  %1059 = vrcp.f32 %v102_v17 }
  0xfa   :  { %v1060_v18 = vpop.eup %1059 }
 0x15e   :  { %v113_v19 = vpop.permute.xlu0 %112 }
 0x15f   :  { %v115_v20 = vmul.f32 %v1060_v18, %v113_v19 }
 0x161   :  { %117 = vrot.lane.b32.xlu1 %v115_v20, %s1123_s28 }
 0x162   :  { %v108_v21 = vpop.permute.xlu0 %107 }
 0x163   :  { %v110_v22 = vmul.f32 %v1060_v18, %v108_v21 }
 0x1d3   :  { %v118_v23 = vpop.permute.xlu1 %117 }
 0x1d4   :  { %v120_v24 = vadd.f32 %v118_v23, %v110_v22  ;;  %v862_v23 = vld [vmem:[%s1289_s0 + $0x8] sm:$0x3] }
 0x1d6   :  { %1061 = vtanh.f32 %v120_v24 }
 0x1e0   :  { %v1062_v25 = vpop.eup %1061 }
 0x1e1   :  { %123 = vrot.lane.b32.xlu1 %v1062_v25, %s1122_s25 }
 0x253   :  { %v124_v26 = vpop.permute.xlu1 %123 }
 0x254   :  { %v126_v27 = vmul.f32 %v1060_v18, %v124_v26 }
 0x256   :  { %130 = vrot.lane.b32.xlu0 %v126_v27, %s1123_s28 }
 0x2c8   :  { %v131_v28 = vpop.permute.xlu0 %130 }
 0x2c9   :  { %934 = vmatmul.mubr.msk.f32.vlgmr.msra.gmra.mrb[0].mxu1 %vm24_vm1, %v131_v28 }
 0x2ca   :  { %1022 = vmatpush3.bf16.msra.mxu1 %v1161_v5  ;;  %955 = vmatprep.mubr.msk.f32.mxu1 %vm1120_vm0, %v1121_v4 }
 0x2cb   :  { %1023 = vmatprep.subr.bf16.mxu1 %v1119_v0 }
 0x2ce   :  { %1025 = vmatpush3.bf16.msra.mxu1 %v1170_v7 }
 0x2cf   :  { %1032 = vmatprep.subr.bf16.mxu1 %v1119_v0 }
 0x39c   :  { %v200_v30 = vpop.f32.mrb[0].mxu1 }
 0x39d   :  { %v204_v31 = vadd.f32 %v853_v29, %v200_v30  ;;  %v935_v32 = vpop.f32.mrb[1].mxu1 }
 0x39f   :  { %1063 = vtanh.f32 %v204_v31  ;;  %v855_v34 = vmul.f32 -1.442695, %v204_v31 }
 0x3a1   :  { %1065 = vpow2.f32 %v855_v34 }
 0x3a9   :  { %v1064_v33 = vpop.eup %1063 }
 0x3aa   :  { %214 = vrot.lane.b32.xlu1 %v1064_v33, %s1122_s25 }
 0x3ab   :  { %v1066_v35 = vpop.eup %1065 }
 0x3ac   :  { %v208_v36 = vadd.f32 1.0, %v1066_v35 }
 0x3ae   :  { %1067 = vrcp.f32 %v208_v36 }
 0x3b8   :  { %v1068_v37 = vpop.eup %1067 }
 0x3b9   :  { %v212_v40 = vmul.f32 %v1068_v37, %v120_v24 }
 0x41c   :  { %v215_v38 = vpop.permute.xlu1 %214 }
 0x41d   :  { %v217_v39 = vmul.f32 %v1068_v37, %v215_v38 }
 0x41f   :  { %219 = vrot.lane.b32.xlu0 %v217_v39, %s1123_s28 }
 0x491   :  { %v220_v41 = vpop.permute.xlu0 %219 }
 0x492   :  { %v222_v42 = vadd.f32 %v220_v41, %v212_v40  ;;  %v865_v41 = vld [vmem:[%s1289_s0 + $0xa] sm:$0x3] }
 0x494   :  { %1069 = vtanh.f32 %v222_v42 }
 0x49e   :  { %v1070_v43 = vpop.eup %1069 }
 0x49f   :  { %225 = vrot.lane.b32.xlu1 %v1070_v43, %s1122_s25 }
 0x511   :  { %v226_v44 = vpop.permute.xlu1 %225 }
 0x512   :  { %v228_v45 = vmul.f32 %v1068_v37, %v226_v44 }
 0x514   :  { %232 = vrot.lane.b32.xlu0 %v228_v45, %s1123_s28 }
 0x586   :  { %v233_v46 = vpop.permute.xlu0 %232 }
 0x587   :  { %945 = vmatmul.mubr.msk.f32.vlgmr.msra.gmra.mrb[2].mxu0 %vm24_vm1, %v233_v46 }
 0x588   :  { %1028 = vmatpush3.bf16.msra.mxu0 %v1161_v5  ;;  %966 = vmatprep.mubr.msk.f32.mxu0 %vm1120_vm0, %v1121_v4 }
 0x589   :  { %1029 = vmatprep.subr.bf16.mxu0 %v1119_v0 }
 0x58c   :  { %1031 = vmatpush3.bf16.msra.mxu0 %v1170_v7 }
 0x58d   :  { %1038 = vmatprep.subr.bf16.mxu0 %v1119_v0 }
 0x65a   :  { %v302_v48 = vpop.f32.mrb[2].mxu0 }
 0x65b   :  { %v306_v49 = vadd.f32 %v856_v47, %v302_v48  ;;  %v946_v50 = vpop.f32.mrb[3].mxu0 }
 0x65d   :  { %1071 = vtanh.f32 %v306_v49  ;;  %v858_v52 = vmul.f32 -1.442695, %v306_v49 }
 0x65f   :  { %1073 = vpow2.f32 %v858_v52 }
 0x667   :  { %v1072_v51 = vpop.eup %1071 }
 0x668   :  { %316 = vrot.lane.b32.xlu1 %v1072_v51, %s1122_s25 }
 0x669   :  { %v1074_v53 = vpop.eup %1073 }
 0x66a   :  { %v310_v54 = vadd.f32 1.0, %v1074_v53 }
 0x66c   :  { %1075 = vrcp.f32 %v310_v54 }
 0x676   :  { %v1076_v55 = vpop.eup %1075 }
 0x677   :  { %v314_v58 = vmul.f32 %v1076_v55, %v222_v42 }
 0x6da   :  { %v317_v56 = vpop.permute.xlu1 %316 }
 0x6db   :  { %v319_v57 = vmul.f32 %v1076_v55, %v317_v56 }
 0x6dd   :  { %321 = vrot.lane.b32.xlu0 %v319_v57, %s1123_s28 }
 0x74f   :  { %v322_v59 = vpop.permute.xlu0 %321 }
 0x750   :  { %v324_v60 = vadd.f32 %v322_v59, %v314_v58 }
 0x752   :  { %1077 = vtanh.f32 %v324_v60 }
 0x75c   :  { %v1078_v61 = vpop.eup %1077 }
 0x75d   :  { %327 = vrot.lane.b32.xlu1 %v1078_v61, %s1122_s25 }
 0x7cf   :  { %v328_v62 = vpop.permute.xlu1 %327 }
 0x7d0   :  { %v330_v63 = vmul.f32 %v1076_v55, %v328_v62  ;;  %v868_v55 = vld [vmem:[%s1289_s0 + $0xc] sm:$0x3] }
 0x7d2   :  { %334 = vrot.lane.b32.xlu0 %v330_v63, %s1123_s28 }
 0x844   :  { %v335_v1 = vpop.permute.xlu0 %334 }
 0x845   :  { %956 = vmatmul.mubr.msk.f32.vlgmr.msra.gmra.mrb[2].mxu1 %vm24_vm1, %v335_v1 }
 0x846   :  { %1034 = vmatpush3.bf16.msra.mxu1 %v1161_v5  ;;  %977 = vmatprep.mubr.msk.f32.mxu1 %vm1120_vm0, %v1121_v4 }
 0x847   :  { %1035 = vmatprep.subr.bf16.mxu1 %v1119_v0 }
 0x84a   :  { %1037 = vmatpush3.bf16.msra.mxu1 %v1170_v7 }
 0x84b   :  { %1044 = vmatprep.subr.bf16.mxu1 %v1119_v0 }
 0x918   :  { %v404_v3 = vpop.f32.mrb[2].mxu1 }
 0x919   :  { %v408_v6 = vadd.f32 %v859_v2, %v404_v3  ;;  %v957_v8 = vpop.f32.mrb[3].mxu1 }
 0x91b   :  { %1079 = vtanh.f32 %v408_v6  ;;  %v861_v10 = vmul.f32 -1.442695, %v408_v6 }
 0x91d   :  { %1081 = vpow2.f32 %v861_v10 }
 0x925   :  { %v1080_v9 = vpop.eup %1079 }
 0x926   :  { %418 = vrot.lane.b32.xlu1 %v1080_v9, %s1122_s25 }
 0x927   :  { %v1082_v11 = vpop.eup %1081 }
 0x928   :  { %v412_v12 = vadd.f32 1.0, %v1082_v11 }
 0x92a   :  { %1083 = vrcp.f32 %v412_v12 }
 0x934   :  { %v1084_v13 = vpop.eup %1083 }
 0x935   :  { %v416_v16 = vmul.f32 %v1084_v13, %v324_v60 }
 0x998   :  { %v419_v14 = vpop.permute.xlu1 %418 }
 0x999   :  { %v421_v15 = vmul.f32 %v1084_v13, %v419_v14 }
 0x99b   :  { %423 = vrot.lane.b32.xlu0 %v421_v15, %s1123_s28 }
 0xa0d   :  { %v424_v17 = vpop.permute.xlu0 %423 }
 0xa0e   :  { %v426_v18 = vadd.f32 %v424_v17, %v416_v16 }
 0xa10   :  { %1085 = vtanh.f32 %v426_v18 }
 0xa1a   :  { %v1086_v19 = vpop.eup %1085 }
 0xa1b   :  { %429 = vrot.lane.b32.xlu1 %v1086_v19, %s1122_s25 }
 0xa8d   :  { %v430_v20 = vpop.permute.xlu1 %429 }
 0xa8e   :  { %v432_v21 = vmul.f32 %v1084_v13, %v430_v20  ;;  %v871_v13 = vld [vmem:[%s1289_s0 + $0xe] sm:$0x3] }
 0xa90   :  { %436 = vrot.lane.b32.xlu0 %v432_v21, %s1123_s28 }
 0xb02   :  { %v437_v22 = vpop.permute.xlu0 %436 }
 0xb03   :  { %967 = vmatmul.mubr.msk.f32.vlgmr.msra.gmra.mrb[4].mxu0 %vm24_vm1, %v437_v22 }
 0xb04   :  { %1040 = vmatpush3.bf16.msra.mxu0 %v1161_v5  ;;  %988 = vmatprep.mubr.msk.f32.mxu0 %vm1120_vm0, %v1121_v4 }
 0xb05   :  { %1041 = vmatprep.subr.bf16.mxu0 %v1119_v0 }
 0xb08   :  { %1043 = vmatpush3.bf16.msra.mxu0 %v1170_v7 }
 0xbd6   :  { %v506_v24 = vpop.f32.mrb[4].mxu0 }
 0xbd7   :  { %v510_v25 = vadd.f32 %v862_v23, %v506_v24  ;;  %v968_v26 = vpop.f32.mrb[5].mxu0 }
 0xbd9   :  { %1087 = vtanh.f32 %v510_v25  ;;  %v864_v28 = vmul.f32 -1.442695, %v510_v25 }
 0xbdb   :  { %1089 = vpow2.f32 %v864_v28 }
 0xbe3   :  { %v1088_v27 = vpop.eup %1087 }
 0xbe4   :  { %520 = vrot.lane.b32.xlu1 %v1088_v27, %s1122_s25 }
 0xbe5   :  { %v1090_v29 = vpop.eup %1089 }
 0xbe6   :  { %v514_v30 = vadd.f32 1.0, %v1090_v29 }
 0xbe8   :  { %1091 = vrcp.f32 %v514_v30 }
 0xbf2   :  { %v1092_v31 = vpop.eup %1091 }
 0xbf3   :  { %v518_v34 = vmul.f32 %v1092_v31, %v426_v18 }
 0xc56   :  { %v521_v32 = vpop.permute.xlu1 %520 }
 0xc57   :  { %v523_v33 = vmul.f32 %v1092_v31, %v521_v32 }
 0xc59   :  { %525 = vrot.lane.b32.xlu0 %v523_v33, %s1123_s28 }
 0xccb   :  { %v526_v35 = vpop.permute.xlu0 %525 }
 0xccc   :  { %v528_v36 = vadd.f32 %v526_v35, %v518_v34 }
 0xcce   :  { %1093 = vtanh.f32 %v528_v36 }
 0xcd8   :  { %v1094_v37 = vpop.eup %1093 }
 0xcd9   :  { %531 = vrot.lane.b32.xlu1 %v1094_v37, %s1122_s25 }
 0xd4b   :  { %v532_v38 = vpop.permute.xlu1 %531 }
 0xd4c   :  { %v534_v39 = vmul.f32 %v1092_v31, %v532_v38 }
 0xd4e   :  { %538 = vrot.lane.b32.xlu0 %v534_v39, %s1123_s28 }
 0xdc0   :  { %v539_v40 = vpop.permute.xlu0 %538 }
 0xdc1   :  { %978 = vmatmul.mubr.msk.f32.vlgmr.msra.gmra.mrb[4].mxu1 %vm24_vm1, %v539_v40 }
 0xdc2   :  { %1046 = vmatpush3.bf16.msra.mxu1 %v1161_v5  ;;  %999 = vmatprep.mubr.msk.f32.mxu1 %vm1120_vm0, %v1121_v4 }
 0xdc3   :  { %1047 = vmatprep.subr.bf16.mxu1 %v1119_v0 }
 0xdc6   :  { %1049 = vmatpush3.bf16.msra.mxu1 %v1170_v7 }
 0xe94   :  { %v608_v42 = vpop.f32.mrb[4].mxu1 }
 0xe95   :  { %v612_v43 = vadd.f32 %v865_v41, %v608_v42  ;;  %v979_v44 = vpop.f32.mrb[5].mxu1 }
 0xe97   :  { %1095 = vtanh.f32 %v612_v43  ;;  %v867_v46 = vmul.f32 -1.442695, %v612_v43 }
 0xe99   :  { %1097 = vpow2.f32 %v867_v46 }
 0xea1   :  { %v1096_v45 = vpop.eup %1095 }
 0xea2   :  { %622 = vrot.lane.b32.xlu1 %v1096_v45, %s1122_s25 }
 0xea3   :  { %v1098_v5 = vpop.eup %1097 }
 0xea4   :  { %v616_v47 = vadd.f32 1.0, %v1098_v5 }
 0xea6   :  { %1099 = vrcp.f32 %v616_v47 }
 0xeb0   :  { %v1100_v4 = vpop.eup %1099 }
 0xeb1   :  { %v620_v7 = vmul.f32 %v1100_v4, %v528_v36 }
 0xf14   :  { %v623_v0 = vpop.permute.xlu1 %622 }
 0xf15   :  { %v625_v48 = vmul.f32 %v1100_v4, %v623_v0 }
 0xf17   :  { %627 = vrot.lane.b32.xlu0 %v625_v48, %s1123_s28 }
 0xf89   :  { %v628_v49 = vpop.permute.xlu0 %627 }
 0xf8a   :  { %v630_v50 = vadd.f32 %v628_v49, %v620_v7 }
 0xf8c   :  { %1101 = vtanh.f32 %v630_v50 }
 0xf96   :  { %v1102_v51 = vpop.eup %1101 }
 0xf97   :  { %633 = vrot.lane.b32.xlu1 %v1102_v51, %s1122_s25 }
0x1009   :  { %v634_v52 = vpop.permute.xlu1 %633 }
0x100a   :  { %v636_v53 = vmul.f32 %v1100_v4, %v634_v52 }
0x100c   :  { %640 = vrot.lane.b32.xlu0 %v636_v53, %s1123_s28 }
0x107e   :  { %v641_v54 = vpop.permute.xlu0 %640 }
0x107f   :  { %989 = vmatmul.mubr.msk.f32.vlgmr.msra.gmra.mrb[6].mxu0 %vm24_vm1, %v641_v54 }
0x1152   :  { %v710_v56 = vpop.f32.mrb[6].mxu0 }
0x1153   :  { %v714_v57 = vadd.f32 %v868_v55, %v710_v56  ;;  %v990_v58 = vpop.f32.mrb[7].mxu0 }
0x1155   :  { %1103 = vtanh.f32 %v714_v57  ;;  %v870_v60 = vmul.f32 -1.442695, %v714_v57 }
0x1157   :  { %1105 = vpow2.f32 %v870_v60 }
0x115f   :  { %v1104_v59 = vpop.eup %1103 }
0x1160   :  { %724 = vrot.lane.b32.xlu1 %v1104_v59, %s1122_s25 }
0x1161   :  { %v1106_v61 = vpop.eup %1105 }
0x1162   :  { %v718_v62 = vadd.f32 1.0, %v1106_v61 }
0x1164   :  { %1107 = vrcp.f32 %v718_v62 }
0x116e   :  { %v1108_v63 = vpop.eup %1107 }
0x116f   :  { %v722_v3 = vmul.f32 %v1108_v63, %v630_v50 }
0x11d2   :  { %v725_v1 = vpop.permute.xlu1 %724 }
0x11d3   :  { %v727_v2 = vmul.f32 %v1108_v63, %v725_v1 }
0x11d5   :  { %729 = vrot.lane.b32.xlu0 %v727_v2, %s1123_s28 }
0x1247   :  { %v730_v6 = vpop.permute.xlu0 %729 }
0x1248   :  { %v732_v8 = vadd.f32 %v730_v6, %v722_v3 }
0x124a   :  { %1109 = vtanh.f32 %v732_v8 }
0x1254   :  { %v1110_v9 = vpop.eup %1109 }
0x1255   :  { %735 = vrot.lane.b32.xlu1 %v1110_v9, %s1122_s25 }
0x12c7   :  { %v736_v10 = vpop.permute.xlu1 %735 }
0x12c8   :  { %v738_v11 = vmul.f32 %v1108_v63, %v736_v10 }
0x12ca   :  { %742 = vrot.lane.b32.xlu0 %v738_v11, %s1123_s28 }
0x133c   :  { %v743_v12 = vpop.permute.xlu0 %742 }
0x133d   :  { %1000 = vmatmul.mubr.msk.f32.vlgmr.msra.gmra.mrb[6].mxu1 %vm24_vm1, %v743_v12 }
0x1410   :  { %v812_v14 = vpop.f32.mrb[6].mxu1 }
0x1411   :  { %v816_v15 = vadd.f32 %v871_v13, %v812_v14  ;;  %v1001_v16 = vpop.f32.mrb[7].mxu1 }
0x1413   :  { %1111 = vtanh.f32 %v816_v15  ;;  %v873_v18 = vmul.f32 -1.442695, %v816_v15 }
0x1415   :  { %1113 = vpow2.f32 %v873_v18 }
0x141d   :  { %v1112_v17 = vpop.eup %1111 }
0x141e   :  { %826 = vrot.lane.b32.xlu1 %v1112_v17, %s1122_s25 }
0x141f   :  { %v1114_v19 = vpop.eup %1113 }
0x1420   :  { %v820_v20 = vadd.f32 1.0, %v1114_v19 }
0x1422   :  { %1115 = vrcp.f32 %v820_v20 }
0x142c   :  { %v1116_v21 = vpop.eup %1115 }
0x142d   :  { %v824_v24 = vmul.f32 %v1116_v21, %v732_v8 }
0x1490   :  { %v827_v22 = vpop.permute.xlu1 %826 }
0x1491   :  { %v829_v23 = vmul.f32 %v1116_v21, %v827_v22 }
0x1493   :  { %831 = vrot.lane.b32.xlu0 %v829_v23, %s1123_s28 }
0x1505   :  { %v832_v25 = vpop.permute.xlu0 %831 }
0x1506   :  { %v834_v26 = vadd.f32 %v832_v25, %v824_v24 }
0x1508   :  { %1117 = vtanh.f32 %v834_v26 }
0x1512   :  { %v1118_v27 = vpop.eup %1117 }
0x1513   :  { %837 = vrot.lane.b32.xlu1 %v1118_v27, %s1122_s25 }
0x1585   :  { %v838_v28 = vpop.permute.xlu1 %837 }
0x1586   :  { %v840_v29 = vmul.f32 %v1116_v21, %v838_v28 }
0x1588   :  { %842 = vrot.lane.b32.xlu0 %v840_v29, %s1123_s28 }
0x15fa   :  { %v843_v30 = vpop.permute.xlu0 %842 }
0x15fb   :  { %846 = vst.msk [vmem:[%s1291_s4] sm:$0x3] %vm845_vm2, %v843_v30 }

</bundles_post_ra>
